<compile_context>
chip_gen: v5e
topology: v5e:2x2
jax: 0.10.0
libtpu: 0.0.40
codegen_flags: <defaults>
</compile_context>

<pallas_src>
import math

import jax
import jax.numpy as jnp
from jax.experimental import pallas as pl
from jax.experimental.pallas import tpu as pltpu


def _graph_reasoning_kernel(x_ref, wqkg_ref, bqk_ref, bg_ref, out_ref):
    Bt, S, D = x_ref.shape
    mxu_dtype = wqkg_ref.dtype          # f32 by default, bf16 if requested

    x3 = x_ref[...]                     # (Bt, S, D)
    xf = x3.reshape(Bt * S, D)          # merge leading dims -> tall MXU M dim

    # Fused Q | K | (x @ Wg) projection: one (Bt*S, D) @ (D, 3D) MXU matmul,
    # f32 accumulation, 3*D-lane dense result.
    qkg = jnp.dot(xf.astype(mxu_dtype), wqkg_ref[...],
                  preferred_element_type=jnp.float32)           # (Bt*S, 3D)

    qk = qkg[:, :2 * D] + bqk_ref[...]                          # add bq | bk
    q = qk[:, :D].reshape(Bt, S, D)
    k = qk[:, D:].reshape(Bt, S, D)
    xg = qkg[:, 2 * D:].reshape(Bt, S, D)                       # x @ Wg (no bias yet)

    # Attention scores: contraction over the last dims (no explicit transpose),
    # then a numerically stable row softmax with an EXACT denominator.
    s = jnp.einsum('bqd,bkd->bqk', q.astype(mxu_dtype), k.astype(mxu_dtype),
                   preferred_element_type=jnp.float32)          # (Bt, S, S)
    s_max = jnp.max(s, axis=-1, keepdims=True)
    e = jnp.exp(s - s_max)
    edge = e / jnp.sum(e, axis=-1, keepdims=True)

    # Graph message passing on the pre-projected values:
    #   edge @ (x @ Wg) == (edge @ x) @ Wg   (associativity), then + bg, ReLU.
    sgr = jnp.einsum('bqk,bkd->bqd', edge.astype(mxu_dtype), xg.astype(mxu_dtype),
                     preferred_element_type=jnp.float32)        # (Bt, S, D)
    bg = bg_ref[...].reshape(1, 1, D)
    out = jnp.maximum(sgr + bg, 0.0)
    out_ref[...] = out.astype(out_ref.dtype)


def _pick_block_b(B, S, *, target_rows=2048):
    """Largest divisor of B with block_b * S <= target_rows.

    Small problems (B*S <= target_rows) run as a single grid step: the kernel
    is latency-bound there and splitting only adds ~0.35us/step and shrinks the
    MXU M dim (v5e/v6e are single-TC anyway).  Large batches tile to ~2048-row
    slabs (a (2048, 256) f32 block is 2 MiB; double-buffered in+out is well
    inside even v7x's 64 MiB VMEM) and the resulting multi-step grid is marked
    "parallel" so v7x's two TensorCores share it.
    """
    best = 1
    for cand in range(1, B + 1):
        if B % cand == 0 and cand * S <= target_rows:
            best = cand
    return best


def graph_reasoning(sim_emb, wq, bq, wk, bk, wg, bg, *, block_b=None,
                    mxu_dtype=jnp.float32):
    """sim_emb: (B, S, D) float32. w*: (D, D) stored as (in, out). b*: (D,)."""
    B, S, D = sim_emb.shape
    if block_b is None:
        block_b = _pick_block_b(B, S)
    assert B % block_b == 0, "block_b must divide B"
    grid_steps = B // block_b

    # Fuse Wq | Wk | Wg into a single (D, 3D) projection.  bq|bk become a
    # (1, 2D) bias added to the q|k columns; bg is added AFTER the edge
    # contraction (it must not be folded into the projection bias).
    wqkg = jnp.concatenate([wq, wk, wg], axis=1).astype(mxu_dtype)
    bqk = jnp.concatenate([bq, bk]).reshape(1, 2 * D).astype(jnp.float32)
    bg2 = bg.reshape(1, D).astype(jnp.float32)

    x_spec = pl.BlockSpec((block_b, S, D), lambda b: (b, 0, 0))
    wqkg_spec = pl.BlockSpec((D, 3 * D), lambda b: (0, 0))
    bqk_spec = pl.BlockSpec((1, 2 * D), lambda b: (0, 0))
    bg_spec = pl.BlockSpec((1, D), lambda b: (0, 0))

    # Advisory cost hint so XLA schedules this call sensibly inside the model.
    flops = 2 * B * S * (3 * D * D) + 4 * B * S * S * D
    bytes_accessed = wqkg.dtype.itemsize * wqkg.size + 4 * (
        sim_emb.size + bqk.size + bg2.size + B * S * D)
    cost = pl.CostEstimate(flops=flops, transcendentals=B * S * S,
                           bytes_accessed=bytes_accessed)

    return pl.pallas_call(
        _graph_reasoning_kernel,
        out_shape=jax.ShapeDtypeStruct((B, S, D), sim_emb.dtype),
        grid_spec=pltpu.PrefetchScalarGridSpec(
            num_scalar_prefetch=0,
            grid=(grid_steps,),
            in_specs=[x_spec, wqkg_spec, bqk_spec, bg_spec],
            out_specs=x_spec,
        ),
        compiler_params=pltpu.CompilerParams(
            dimension_semantics=(
                ("parallel",) if grid_steps > 1 else ("arbitrary",))),
        cost_estimate=cost,
    )(sim_emb, wqkg, bqk, bg2)


def init_params(key, sim_dim):
    """Match PyTorch init: uniform(-r, r) with r = sqrt(6)/sqrt(in+out), bias=0.
    Weights returned pre-transposed to (in, out)."""
    r = math.sqrt(6.0) / math.sqrt(sim_dim + sim_dim)
    kq, kk, kg = jax.random.split(key, 3)
    wq = jax.random.uniform(kq, (sim_dim, sim_dim), jnp.float32, -r, r)
    wk = jax.random.uniform(kk, (sim_dim, sim_dim), jnp.float32, -r, r)
    wg = jax.random.uniform(kg, (sim_dim, sim_dim), jnp.float32, -r, r)
    bq = jnp.zeros((sim_dim,), jnp.float32)
    bk = jnp.zeros((sim_dim,), jnp.float32)
    bg = jnp.zeros((sim_dim,), jnp.float32)
    return wq, bq, wk, bk, wg, bg


def graph_reasoning_ref(sim_emb, wq, bq, wk, bk, wg, bg):
    """Pure-JAX reference of the PyTorch forward for validation."""
    q = sim_emb @ wq + bq
    k = sim_emb @ wk + bk
    edge = jax.nn.softmax(jnp.einsum('bqd,bkd->bqk', q, k), axis=-1)
    sgr = jnp.einsum('bqk,bkd->bqd', edge, sim_emb)
    return jax.nn.relu(sgr @ wg + bg)


if __name__ == "__main__":
    # batch, L+1 graph nodes, sim_dim (the module's documented sim_dim is 256,
    # which keeps the lane dim dense/aligned).
    B, S, D = 4, 8, 256
    key = jax.random.PRNGKey(0)
    kx, kp = jax.random.split(key)

    sim_emb = jax.random.normal(kx, (B, S, D), dtype=jnp.float32)
    params = init_params(kp, D)

    out = jax.block_until_ready(graph_reasoning(sim_emb, *params))
    ref = graph_reasoning_ref(sim_emb, *params)

    assert out.shape == (B, S, D)
    # f32 MXU path + exact softmax denominator: only difference vs the
    # reference is the accumulation order of the folded Wg projection.
    assert jnp.allclose(out, ref, atol=2e-3, rtol=2e-3), (
        f"mismatch vs reference: max abs diff {jnp.max(jnp.abs(out - ref))}")

    print("KERNEL_OK")
</pallas_src>

<mosaic_0001>
module attributes {stable_mosaic.version = 11 : i64} {
  func.func @_graph_reasoning_kernel(%arg0: i32, %arg1: memref<4x8x256xf32, #tpu.memory_space<vmem>>, %arg2: memref<256x768xf32, #tpu.memory_space<vmem>>, %arg3: memref<1x512xf32, #tpu.memory_space<vmem>>, %arg4: memref<1x256xf32, #tpu.memory_space<vmem>>, %arg5: memref<4x8x256xf32, #tpu.memory_space<vmem>>) attributes {dimension_semantics = [#tpu.dimension_semantics<arbitrary>], iteration_bounds = array<i64: 1>, scalar_prefetch = 0 : i64, scratch_operands = 0 : i64, tpu.core_type = #tpu.core_type<tc>, window_params = [{transform_indices = @transform_0, window_bounds = array<i64: 4, 8, 256>}, {pipeline_mode = #tpu.pipeline_mode<synchronous>, transform_indices = @transform_1, window_bounds = array<i64: 256, 768>}, {pipeline_mode = #tpu.pipeline_mode<synchronous>, transform_indices = @transform_2, window_bounds = array<i64: 1, 512>}, {pipeline_mode = #tpu.pipeline_mode<synchronous>, transform_indices = @transform_3, window_bounds = array<i64: 1, 256>}, {transform_indices = @transform_4, window_bounds = array<i64: 4, 8, 256>}]} {
    %c0 = arith.constant 0 : index
    %c0_0 = arith.constant 0 : index
    %c0_1 = arith.constant 0 : index
    %0 = vector.load %arg1[%c0, %c0_0, %c0_1] : memref<4x8x256xf32, #tpu.memory_space<vmem>>, vector<4x8x256xf32>
    %1 = vector.shape_cast %0 : vector<4x8x256xf32> to vector<32x256xf32>
    %c0_2 = arith.constant 0 : index
    %c0_3 = arith.constant 0 : index
    %2 = vector.load %arg2[%c0_2, %c0_3] : memref<256x768xf32, #tpu.memory_space<vmem>>, vector<256x768xf32>
    %cst = arith.constant dense<0.000000e+00> : vector<32x768xf32>
    %3 = tpu.matmul %1, %2, %cst {dimension_numbers = #tpu.dot_dimension_numbers<[1], [0], [0], [1], [0, 0, 1, 1], [], []>} : vector<32x256xf32>, vector<256x768xf32>, vector<32x768xf32> -> vector<32x768xf32>
    %4 = vector.extract_strided_slice %3 {offsets = [0, 0], sizes = [32, 512], strides = [1, 1]} : vector<32x768xf32> to vector<32x512xf32>
    %c0_4 = arith.constant 0 : index
    %c0_5 = arith.constant 0 : index
    %5 = vector.load %arg3[%c0_4, %c0_5] : memref<1x512xf32, #tpu.memory_space<vmem>>, vector<1x512xf32>
    %6 = vector.broadcast %5 : vector<1x512xf32> to vector<32x512xf32>
    %7 = arith.addf %4, %6 : vector<32x512xf32>
    %8 = vector.extract_strided_slice %7 {offsets = [0, 0], sizes = [32, 256], strides = [1, 1]} : vector<32x512xf32> to vector<32x256xf32>
    %9 = vector.shape_cast %8 : vector<32x256xf32> to vector<4x8x256xf32>
    %10 = vector.extract_strided_slice %7 {offsets = [0, 256], sizes = [32, 256], strides = [1, 1]} : vector<32x512xf32> to vector<32x256xf32>
    %11 = vector.shape_cast %10 : vector<32x256xf32> to vector<4x8x256xf32>
    %12 = vector.extract_strided_slice %3 {offsets = [0, 512], sizes = [32, 256], strides = [1, 1]} : vector<32x768xf32> to vector<32x256xf32>
    %13 = vector.shape_cast %12 : vector<32x256xf32> to vector<4x8x256xf32>
    "tpu.trace_start"() <{level = 10 : i32, message = "bqd,bkd->bqk"}> : () -> ()
    %cst_6 = arith.constant dense<0.000000e+00> : vector<4x8x8xf32>
    %14 = tpu.matmul %9, %11, %cst_6 {dimension_numbers = #tpu.dot_dimension_numbers<[2], [2], [1], [1], [0, 0, 0, 1, 1, 1], [0], [0]>} : vector<4x8x256xf32>, vector<4x8x256xf32>, vector<4x8x8xf32> -> vector<4x8x8xf32>
    "tpu.trace_stop"() : () -> ()
    %cst_7 = arith.constant dense<0xFF800000> : vector<4x8xf32>
    %15 = vector.multi_reduction <maximumf>, %14, %cst_7 [2] : vector<4x8x8xf32> to vector<4x8xf32>
    %16 = vector.shape_cast %15 : vector<4x8xf32> to vector<4x8x1xf32>
    %17 = vector.broadcast %16 : vector<4x8x1xf32> to vector<4x8x8xf32>
    %18 = arith.subf %14, %17 : vector<4x8x8xf32>
    %19 = math.exp %18 : vector<4x8x8xf32>
    %cst_8 = arith.constant dense<0.000000e+00> : vector<4x8xf32>
    %20 = vector.multi_reduction <add>, %19, %cst_8 [2] : vector<4x8x8xf32> to vector<4x8xf32>
    %21 = vector.shape_cast %20 : vector<4x8xf32> to vector<4x8x1xf32>
    %22 = vector.broadcast %21 : vector<4x8x1xf32> to vector<4x8x8xf32>
    %23 = arith.divf %19, %22 : vector<4x8x8xf32>
    "tpu.trace_start"() <{level = 10 : i32, message = "bqk,bkd->bqd"}> : () -> ()
    %cst_9 = arith.constant dense<0.000000e+00> : vector<4x8x256xf32>
    %24 = tpu.matmul %23, %13, %cst_9 {dimension_numbers = #tpu.dot_dimension_numbers<[2], [1], [1], [2], [0, 0, 0, 1, 1, 2], [0], [0]>} : vector<4x8x8xf32>, vector<4x8x256xf32>, vector<4x8x256xf32> -> vector<4x8x256xf32>
    "tpu.trace_stop"() : () -> ()
    %c0_10 = arith.constant 0 : index
    %c0_11 = arith.constant 0 : index
    %25 = vector.load %arg4[%c0_10, %c0_11] : memref<1x256xf32, #tpu.memory_space<vmem>>, vector<1x256xf32>
    %26 = vector.shape_cast %25 : vector<1x256xf32> to vector<1x1x256xf32>
    %27 = vector.broadcast %26 : vector<1x1x256xf32> to vector<4x8x256xf32>
    %28 = arith.addf %24, %27 : vector<4x8x256xf32>
    %cst_12 = arith.constant 0.000000e+00 : f32
    %29 = vector.broadcast %cst_12 : f32 to vector<4x8x256xf32>
    %30 = arith.maximumf %28, %29 : vector<4x8x256xf32>
    %c0_13 = arith.constant 0 : index
    %c0_14 = arith.constant 0 : index
    %c0_15 = arith.constant 0 : index
    %31 = vector.load %arg5[%c0_13, %c0_14, %c0_15] : memref<4x8x256xf32, #tpu.memory_space<vmem>>, vector<4x8x256xf32>
    tpu.vector_store %arg5[%c0_13, %c0_14, %c0_15], %30 {strides = array<i32>} : memref<4x8x256xf32, #tpu.memory_space<vmem>>, vector<4x8x256xf32>,
    return
  }
  func.func @transform_0(%arg0: i32) -> (i32, i32, i32) {
    %c0_i32 = arith.constant 0 : i32
    %c0_i32_0 = arith.constant 0 : i32
    %c0_i32_1 = arith.constant 0 : i32
    return %arg0, %c0_i32, %c0_i32_0 : i32, i32, i32
  }
  func.func @transform_1(%arg0: i32) -> (i32, i32) {
    %c0_i32 = arith.constant 0 : i32
    %c0_i32_0 = arith.constant 0 : i32
    %c0_i32_1 = arith.constant 0 : i32
    return %c0_i32, %c0_i32_0 : i32, i32
  }
  func.func @transform_2(%arg0: i32) -> (i32, i32) {
    %c0_i32 = arith.constant 0 : i32
    %c0_i32_0 = arith.constant 0 : i32
    %c0_i32_1 = arith.constant 0 : i32
    return %c0_i32, %c0_i32_0 : i32, i32
  }
  func.func @transform_3(%arg0: i32) -> (i32, i32) {
    %c0_i32 = arith.constant 0 : i32
    %c0_i32_0 = arith.constant 0 : i32
    %c0_i32_1 = arith.constant 0 : i32
    return %c0_i32, %c0_i32_0 : i32, i32
  }
  func.func @transform_4(%arg0: i32) -> (i32, i32, i32) {
    %c0_i32 = arith.constant 0 : i32
    %c0_i32_0 = arith.constant 0 : i32
    %c0_i32_1 = arith.constant 0 : i32
    return %arg0, %c0_i32, %c0_i32_0 : i32, i32, i32
  }
}

</mosaic_0001>

<bundles_post_ra>
// kernel: tpu_custom_call.1
= control target key start
LH: loop header
LB: loop body
LE: loop exit
PB: predicated region body
PF: predicated region fallthrough
CT: control target
= control target key end

     0   :  { %9 = vsyncpa [#allocation3], 0  ;;  %s1390_s0 = inlined_call_operand.hbm [shape: f32[4,8,256], index: 0, kind: input, shape index: {}]   ;;  %s1391_s1 = inlined_call_operand.hbm [shape: f32[256,768], index: 1, kind: input, shape index: {}]   ;;  %s1392_s2 = inlined_call_operand.hbm [shape: f32[1,512], index: 2, kind: input, shape index: {}]   ;;  %s1393_s3 = inlined_call_operand.vmem [shape: f32[1,256], index: 3, kind: input, shape index: {}]   ;;  %s1394_s4 = inlined_call_operand.hbm [shape: f32[4,8,256], index: 4, kind: output, shape index: {}]  }
   0x1   :  { %10 = vsyncpa [#allocation6], 0  ;;  %s29_s17 = sshll.u32 %s1391_s1, 4  ;;  %s30_s17 = int_to_ptr.hbm [resolvable:$true] %s29_s17 }
   0x2   :  { %11 = vsyncpa [#allocation4], 0  ;;  %s1242_s18 = smov [#allocation5]   ;;  %s16_s22 = sshll.u32 %s1390_s0, 4  ;;  %s17_s22 = int_to_ptr.hbm [resolvable:$true] %s16_s22 }
   0x3   :  { %s31_s19 = sshll.u32 %s1242_s18, 4  ;;  %s1243_s23 = smov 768   ;;  %s32_s19 = int_to_ptr.vmem [resolvable:$true] %s31_s19 }
   0x4   :  { %s1244_s24 = smov 48   ;;  %s1245_s25 = smov [#allocation2]  }
   0x5   :  { %37 = dma.hbm_to_vmem [thread:$0]  %s30_s17, 24576, %s32_s19, [#allocation6], %s1243_s23, %s1243_s23, %s1244_s24  }
   0x6   :  { %s18_s26 = sshll.u32 %s1245_s25, 4  ;;  %s1246_s27 = smov 256   ;;  %s19_s26 = int_to_ptr.vmem [resolvable:$true] %s18_s26 }
   0x7   :  { %s1247_s28 = smov 16   ;;  %s43_s30 = sshll.u32 %s1392_s2, 4  ;;  %s44_s30 = int_to_ptr.hbm [resolvable:$true] %s43_s30 }
   0x8   :  { %24 = dma.hbm_to_vmem [thread:$0]  %s17_s22, 1024, %s19_s26, [#allocation3], %s1246_s27, %s1246_s27, %s1247_s28  }
   0x9   :  { %s1248_s5 = smov [#allocation7]  }
   0xa   :  { %s45_s0 = sshll.u32 %s1248_s5, 4  ;;  %s46_s0 = int_to_ptr.vmem [resolvable:$true] %s45_s0 }
   0xb   :  { %48 = dma.hbm_to_vmem [thread:$0]  %s44_s30, 64, %s46_s0, [#allocation6]  }
   0xc   :  { %1236 = dma.done.wait [#allocation3], 1024  }
   0xd   :  { %1237 = vsyncadd [#allocation3], 4294966272 }
   0xe   :  { %1238 = dma.done.wait [#allocation6], 24640  }
   0xf   :  { %1239 = vsyncadd [#allocation6], 4294942656  ;;  %v161_v0 = vld [vmem:[#allocation5 + $0x2d0] sm:$0xff]  ;;  %v162_v2 = vld [vmem:[#allocation5 + $0x2d8] sm:$0xff]  ;;  %vm797_vm0 = vcmask 64512   ;;  %s1094_s10 = sshll.u32 %s1394_s4, 4  ;;  %s1095_s10 = int_to_ptr.hbm [resolvable:$true] %s1094_s10 }
  0x10   :  { %v257_v1 = vld [vmem:[#allocation5 + $0x5d0] sm:$0xff]  ;;  %263 = vmatpush.msra.mxu0 %v161_v0  ;;  %v258_v3 = vld [vmem:[#allocation5 + $0x5d8] sm:$0xff]  ;;  %v155_v4 = vld [vmem:[#allocation5 + $0x2a0] sm:$0xff]  ;;  %321 = vmatpush.msra.mxu2 %v162_v2 }
  0x11   :  { %292 = vmatpush.msra.mxu1 %v257_v1  ;;  %v251_v5 = vld [vmem:[#allocation5 + $0x5a0] sm:$0xff]  ;;  %350 = vmatpush.msra.mxu3 %v258_v3  ;;  %v156_v6 = vld [vmem:[#allocation5 + $0x2a8] sm:$0xff]  ;;  %v149_v8 = vld [vmem:[#allocation5 + $0x270] sm:$0xff] }
  0x12   :  { %v252_v7 = vld [vmem:[#allocation5 + $0x5a8] sm:$0xff]  ;;  %264 = vmatpush.msra.mxu0 %v155_v4  ;;  %v245_v9 = vld [vmem:[#allocation5 + $0x570] sm:$0xff]  ;;  %v150_v10 = vld [vmem:[#allocation5 + $0x278] sm:$0xff]  ;;  %322 = vmatpush.msra.mxu2 %v156_v6 }
  0x13   :  { %293 = vmatpush.msra.mxu1 %v251_v5  ;;  %v246_v11 = vld [vmem:[#allocation5 + $0x578] sm:$0xff]  ;;  %351 = vmatpush.msra.mxu3 %v252_v7  ;;  %v143_v12 = vld [vmem:[#allocation5 + $0x240] sm:$0xff]  ;;  %v144_v14 = vld [vmem:[#allocation5 + $0x248] sm:$0xff] }
  0x14   :  { %v239_v13 = vld [vmem:[#allocation5 + $0x540] sm:$0xff]  ;;  %265 = vmatpush.msra.mxu0 %v149_v8  ;;  %v240_v15 = vld [vmem:[#allocation5 + $0x548] sm:$0xff]  ;;  %323 = vmatpush.msra.mxu2 %v150_v10  ;;  %v137_v16 = vld [vmem:[#allocation5 + $0x210] sm:$0xff] }
  0x15   :  { %294 = vmatpush.msra.mxu1 %v245_v9  ;;  %352 = vmatpush.msra.mxu3 %v246_v11  ;;  %v233_v17 = vld [vmem:[#allocation5 + $0x510] sm:$0xff]  ;;  %v138_v18 = vld [vmem:[#allocation5 + $0x218] sm:$0xff]  ;;  %v131_v20 = vld [vmem:[#allocation5 + $0x1e0] sm:$0xff] }
  0x16   :  { %266 = vmatpush.msra.mxu0 %v143_v12  ;;  %v234_v19 = vld [vmem:[#allocation5 + $0x518] sm:$0xff]  ;;  %324 = vmatpush.msra.mxu2 %v144_v14  ;;  %v227_v21 = vld [vmem:[#allocation5 + $0x4e0] sm:$0xff]  ;;  %v132_v22 = vld [vmem:[#allocation5 + $0x1e8] sm:$0xff] }
  0x17   :  { %295 = vmatpush.msra.mxu1 %v239_v13  ;;  %353 = vmatpush.msra.mxu3 %v240_v15  ;;  %v228_v23 = vld [vmem:[#allocation5 + $0x4e8] sm:$0xff]  ;;  %v125_v24 = vld [vmem:[#allocation5 + $0x1b0] sm:$0xff]  ;;  %v126_v26 = vld [vmem:[#allocation5 + $0x1b8] sm:$0xff] }
  0x18   :  { %267 = vmatpush.msra.mxu0 %v137_v16  ;;  %325 = vmatpush.msra.mxu2 %v138_v18  ;;  %v221_v25 = vld [vmem:[#allocation5 + $0x4b0] sm:$0xff]  ;;  %v222_v27 = vld [vmem:[#allocation5 + $0x4b8] sm:$0xff]  ;;  %v119_v28 = vld [vmem:[#allocation5 + $0x180] sm:$0xff] }
  0x19   :  { %296 = vmatpush.msra.mxu1 %v233_v17  ;;  %354 = vmatpush.msra.mxu3 %v234_v19  ;;  %v215_v29 = vld [vmem:[#allocation5 + $0x480] sm:$0xff]  ;;  %v120_v30 = vld [vmem:[#allocation5 + $0x188] sm:$0xff]  ;;  %v113_v32 = vld [vmem:[#allocation5 + $0x150] sm:$0xff] }
  0x1a   :  { %268 = vmatpush.msra.mxu0 %v131_v20  ;;  %326 = vmatpush.msra.mxu2 %v132_v22  ;;  %v216_v31 = vld [vmem:[#allocation5 + $0x488] sm:$0xff]  ;;  %v209_v33 = vld [vmem:[#allocation5 + $0x450] sm:$0xff]  ;;  %v114_v34 = vld [vmem:[#allocation5 + $0x158] sm:$0xff] }
  0x1b   :  { %297 = vmatpush.msra.mxu1 %v227_v21  ;;  %355 = vmatpush.msra.mxu3 %v228_v23  ;;  %v210_v35 = vld [vmem:[#allocation5 + $0x458] sm:$0xff]  ;;  %v107_v36 = vld [vmem:[#allocation5 + $0x120] sm:$0xff]  ;;  %v108_v38 = vld [vmem:[#allocation5 + $0x128] sm:$0xff] }
  0x1c   :  { %269 = vmatpush.msra.mxu0 %v125_v24  ;;  %327 = vmatpush.msra.mxu2 %v126_v26  ;;  %v203_v37 = vld [vmem:[#allocation5 + $0x420] sm:$0xff]  ;;  %v204_v39 = vld [vmem:[#allocation5 + $0x428] sm:$0xff]  ;;  %v101_v40 = vld [vmem:[#allocation5 + $0xf0] sm:$0xff] }
  0x1d   :  { %298 = vmatpush.msra.mxu1 %v221_v25  ;;  %356 = vmatpush.msra.mxu3 %v222_v27  ;;  %v197_v41 = vld [vmem:[#allocation5 + $0x3f0] sm:$0xff]  ;;  %v102_v42 = vld [vmem:[#allocation5 + $0xf8] sm:$0xff]  ;;  %v95_v44 = vld [vmem:[#allocation5 + $0xc0] sm:$0xff] }
  0x1e   :  { %270 = vmatpush.msra.mxu0 %v119_v28  ;;  %328 = vmatpush.msra.mxu2 %v120_v30  ;;  %v198_v43 = vld [vmem:[#allocation5 + $0x3f8] sm:$0xff]  ;;  %v191_v45 = vld [vmem:[#allocation5 + $0x3c0] sm:$0xff]  ;;  %v96_v46 = vld [vmem:[#allocation5 + $0xc8] sm:$0xff] }
  0x1f   :  { %299 = vmatpush.msra.mxu1 %v215_v29  ;;  %357 = vmatpush.msra.mxu3 %v216_v31  ;;  %v192_v47 = vld [vmem:[#allocation5 + $0x3c8] sm:$0xff]  ;;  %v89_v48 = vld [vmem:[#allocation5 + $0x90] sm:$0xff]  ;;  %v90_v50 = vld [vmem:[#allocation5 + $0x98] sm:$0xff] }
  0x20   :  { %271 = vmatpush.msra.mxu0 %v113_v32  ;;  %329 = vmatpush.msra.mxu2 %v114_v34  ;;  %v185_v49 = vld [vmem:[#allocation5 + $0x390] sm:$0xff]  ;;  %v186_v51 = vld [vmem:[#allocation5 + $0x398] sm:$0xff]  ;;  %v83_v52 = vld [vmem:[#allocation5 + $0x60] sm:$0xff] }
  0x21   :  { %300 = vmatpush.msra.mxu1 %v209_v33  ;;  %358 = vmatpush.msra.mxu3 %v210_v35  ;;  %v179_v53 = vld [vmem:[#allocation5 + $0x360] sm:$0xff]  ;;  %v84_v54 = vld [vmem:[#allocation5 + $0x68] sm:$0xff]  ;;  %v77_v56 = vld [vmem:[#allocation5 + $0x30] sm:$0xff] }
  0x22   :  { %272 = vmatpush.msra.mxu0 %v107_v36  ;;  %330 = vmatpush.msra.mxu2 %v108_v38  ;;  %v180_v55 = vld [vmem:[#allocation5 + $0x368] sm:$0xff]  ;;  %v173_v57 = vld [vmem:[#allocation5 + $0x330] sm:$0xff]  ;;  %v78_v58 = vld [vmem:[#allocation5 + $0x38] sm:$0xff] }
  0x23   :  { %301 = vmatpush.msra.mxu1 %v203_v37  ;;  %359 = vmatpush.msra.mxu3 %v204_v39  ;;  %v174_v59 = vld [vmem:[#allocation5 + $0x338] sm:$0xff]  ;;  %v71_v60 = vld [vmem:[#allocation5] sm:$0xff]  ;;  %v72_v62 = vld [vmem:[#allocation5 + $0x8] sm:$0xff] }
  0x24   :  { %273 = vmatpush.msra.mxu0 %v101_v40  ;;  %331 = vmatpush.msra.mxu2 %v102_v42  ;;  %v167_v61 = vld [vmem:[#allocation5 + $0x300] sm:$0xff]  ;;  %v168_v63 = vld [vmem:[#allocation5 + $0x308] sm:$0xff]  ;;  %v157_v6 = vld [vmem:[#allocation5 + $0x2b0] sm:$0xff] }
  0x25   :  { %302 = vmatpush.msra.mxu1 %v197_v41  ;;  %360 = vmatpush.msra.mxu3 %v198_v43  ;;  %v1287_v0 = vld [vmem:[#allocation2] sm:$0xff]  ;;  %v1289_v1 = vld [vmem:[#allocation2 + $0x8] sm:$0xff]  ;;  %v253_v7 = vld [vmem:[#allocation5 + $0x5b0] sm:$0xff] }
  0x26   :  { %274 = vmatpush.msra.mxu0 %v95_v44  ;;  %332 = vmatpush.msra.mxu2 %v96_v46  ;;  %v163_v2 = vld [vmem:[#allocation5 + $0x2e0] sm:$0xff]  ;;  %v164_v4 = vld [vmem:[#allocation5 + $0x2e8] sm:$0xff]  ;;  %v158_v8 = vld [vmem:[#allocation5 + $0x2b8] sm:$0xff] }
  0x27   :  { %303 = vmatpush.msra.mxu1 %v191_v45  ;;  %361 = vmatpush.msra.mxu3 %v192_v47  ;;  %v259_v3 = vld [vmem:[#allocation5 + $0x5e0] sm:$0xff]  ;;  %v260_v5 = vld [vmem:[#allocation5 + $0x5e8] sm:$0xff]  ;;  %v254_v9 = vld [vmem:[#allocation5 + $0x5b8] sm:$0xff] }
  0x28   :  { %275 = vmatpush.msra.mxu0 %v89_v48  ;;  %333 = vmatpush.msra.mxu2 %v90_v50  ;;  %v151_v10 = vld [vmem:[#allocation5 + $0x280] sm:$0xff]  ;;  %v152_v12 = vld [vmem:[#allocation5 + $0x288] sm:$0xff]  ;;  %v145_v14 = vld [vmem:[#allocation5 + $0x250] sm:$0xff] }
  0x29   :  { %304 = vmatpush.msra.mxu1 %v185_v49  ;;  %362 = vmatpush.msra.mxu3 %v186_v51  ;;  %v247_v11 = vld [vmem:[#allocation5 + $0x580] sm:$0xff]  ;;  %v248_v13 = vld [vmem:[#allocation5 + $0x588] sm:$0xff]  ;;  %v241_v15 = vld [vmem:[#allocation5 + $0x550] sm:$0xff] }
  0x2a   :  { %276 = vmatpush.msra.mxu0 %v83_v52  ;;  %334 = vmatpush.msra.mxu2 %v84_v54  ;;  %v146_v16 = vld [vmem:[#allocation5 + $0x258] sm:$0xff]  ;;  %v1295_v18 = vld [vmem:[#allocation2 + $0x10] sm:$0xff]  ;;  %v139_v20 = vld [vmem:[#allocation5 + $0x220] sm:$0xff] }
  0x2b   :  { %305 = vmatpush.msra.mxu1 %v179_v53  ;;  %363 = vmatpush.msra.mxu3 %v180_v55  ;;  %v242_v17 = vld [vmem:[#allocation5 + $0x558] sm:$0xff]  ;;  %v235_v21 = vld [vmem:[#allocation5 + $0x520] sm:$0xff]  ;;  %v140_v22 = vld [vmem:[#allocation5 + $0x228] sm:$0xff] }
  0x2c   :  { %277 = vmatpush.msra.mxu0 %v77_v56  ;;  %335 = vmatpush.msra.mxu2 %v78_v58  ;;  %v1297_v19 = vld [vmem:[#allocation2 + $0x18] sm:$0xff]  ;;  %v236_v23 = vld [vmem:[#allocation5 + $0x528] sm:$0xff]  ;;  %v133_v24 = vld [vmem:[#allocation5 + $0x1f0] sm:$0xff] }
  0x2d   :  { %306 = vmatpush.msra.mxu1 %v173_v57  ;;  %364 = vmatpush.msra.mxu3 %v174_v59  ;;  %v229_v25 = vld [vmem:[#allocation5 + $0x4f0] sm:$0xff]  ;;  %v134_v26 = vld [vmem:[#allocation5 + $0x1f8] sm:$0xff]  ;;  %v127_v28 = vld [vmem:[#allocation5 + $0x1c0] sm:$0xff] }
  0x2e   :  { %278 = vmatpush.msra.mxu0 %v71_v60  ;;  %336 = vmatpush.msra.mxu2 %v72_v62  ;;  %v230_v27 = vld [vmem:[#allocation5 + $0x4f8] sm:$0xff]  ;;  %v223_v29 = vld [vmem:[#allocation5 + $0x4c0] sm:$0xff]  ;;  %v128_v30 = vld [vmem:[#allocation5 + $0x1c8] sm:$0xff] }
  0x2f   :  { %307 = vmatpush.msra.mxu1 %v167_v61  ;;  %365 = vmatpush.msra.mxu3 %v168_v63  ;;  %v224_v31 = vld [vmem:[#allocation5 + $0x4c8] sm:$0xff]  ;;  %v121_v32 = vld [vmem:[#allocation5 + $0x190] sm:$0xff]  ;;  %v122_v34 = vld [vmem:[#allocation5 + $0x198] sm:$0xff] }
  0x30   :  { %279 = vmatmul.f32.vlgmr.msra.gmra.mxu0 %v1287_v0  ;;  %308 = vmatmul.f32.vlgmr.msra.gmra.mxu1 %v1289_v1  ;;  %v217_v33 = vld [vmem:[#allocation5 + $0x490] sm:$0xff]  ;;  %v218_v35 = vld [vmem:[#allocation5 + $0x498] sm:$0xff]  ;;  %v1303_v36 = vld [vmem:[#allocation2 + $0x20] sm:$0xff] }
  0x31   :  { %337 = vmatmul.f32.vlgmr.msra.gmra.mxu2 %v1287_v0  ;;  %366 = vmatmul.f32.vlgmr.msra.gmra.mxu3 %v1289_v1  ;;  %v1305_v37 = vld [vmem:[#allocation2 + $0x28] sm:$0xff]  ;;  %v115_v38 = vld [vmem:[#allocation5 + $0x160] sm:$0xff]  ;;  %v109_v42 = vld [vmem:[#allocation5 + $0x130] sm:$0xff] }
  0x32   :  { %379 = vmatpush.msrb.mxu0 %v163_v2  ;;  %408 = vmatpush.msrb.mxu1 %v259_v3  ;;  %v211_v39 = vld [vmem:[#allocation5 + $0x460] sm:$0xff]  ;;  %v116_v40 = vld [vmem:[#allocation5 + $0x168] sm:$0xff]  ;;  %v205_v43 = vld [vmem:[#allocation5 + $0x430] sm:$0xff] }
  0x33   :  { %437 = vmatpush.msrb.mxu2 %v164_v4  ;;  %466 = vmatpush.msrb.mxu3 %v260_v5  ;;  %v212_v41 = vld [vmem:[#allocation5 + $0x468] sm:$0xff]  ;;  %v110_v44 = vld [vmem:[#allocation5 + $0x138] sm:$0xff]  ;;  %v103_v46 = vld [vmem:[#allocation5 + $0x100] sm:$0xff] }
  0x34   :  { %380 = vmatpush.msrb.mxu0 %v157_v6  ;;  %409 = vmatpush.msrb.mxu1 %v253_v7  ;;  %v206_v45 = vld [vmem:[#allocation5 + $0x438] sm:$0xff]  ;;  %v199_v47 = vld [vmem:[#allocation5 + $0x400] sm:$0xff]  ;;  %v104_v48 = vld [vmem:[#allocation5 + $0x108] sm:$0xff] }
  0x35   :  { %438 = vmatpush.msrb.mxu2 %v158_v8  ;;  %467 = vmatpush.msrb.mxu3 %v254_v9  ;;  %v200_v49 = vld [vmem:[#allocation5 + $0x408] sm:$0xff]  ;;  %v97_v50 = vld [vmem:[#allocation5 + $0xd0] sm:$0xff]  ;;  %v98_v52 = vld [vmem:[#allocation5 + $0xd8] sm:$0xff] }
  0x36   :  { %381 = vmatpush.msrb.mxu0 %v151_v10  ;;  %410 = vmatpush.msrb.mxu1 %v247_v11  ;;  %v193_v51 = vld [vmem:[#allocation5 + $0x3d0] sm:$0xff]  ;;  %v194_v53 = vld [vmem:[#allocation5 + $0x3d8] sm:$0xff]  ;;  %v91_v56 = vld [vmem:[#allocation5 + $0xa0] sm:$0xff] }
  0x37   :  { %439 = vmatpush.msrb.mxu2 %v152_v12  ;;  %468 = vmatpush.msrb.mxu3 %v248_v13  ;;  %v1311_v54 = vld [vmem:[#allocation2 + $0x30] sm:$0xff]  ;;  %v1313_v55 = vld [vmem:[#allocation2 + $0x38] sm:$0xff]  ;;  %v187_v57 = vld [vmem:[#allocation5 + $0x3a0] sm:$0xff] }
  0x38   :  { %382 = vmatpush.msrb.mxu0 %v145_v14  ;;  %411 = vmatpush.msrb.mxu1 %v241_v15  ;;  %v92_v58 = vld [vmem:[#allocation5 + $0xa8] sm:$0xff]  ;;  %v85_v60 = vld [vmem:[#allocation5 + $0x70] sm:$0xff]  ;;  %v86_v62 = vld [vmem:[#allocation5 + $0x78] sm:$0xff] }
  0x39   :  { %440 = vmatpush.msrb.mxu2 %v146_v16  ;;  %469 = vmatpush.msrb.mxu3 %v242_v17  ;;  %v188_v59 = vld [vmem:[#allocation5 + $0x3a8] sm:$0xff]  ;;  %v181_v61 = vld [vmem:[#allocation5 + $0x370] sm:$0xff]  ;;  %v182_v63 = vld [vmem:[#allocation5 + $0x378] sm:$0xff] }
  0x3a   :  { %282 = vmatmul.f32.gmra.mxu0 %v1295_v18  ;;  %311 = vmatmul.f32.gmra.mxu1 %v1297_v19  ;;  %v79_v2 = vld [vmem:[#allocation5 + $0x40] sm:$0xff]  ;;  %v80_v4 = vld [vmem:[#allocation5 + $0x48] sm:$0xff]  ;;  %v73_v6 = vld [vmem:[#allocation5 + $0x10] sm:$0xff] }
  0x3b   :  { %340 = vmatmul.f32.gmra.mxu2 %v1295_v18  ;;  %369 = vmatmul.f32.gmra.mxu3 %v1297_v19  ;;  %v175_v3 = vld [vmem:[#allocation5 + $0x340] sm:$0xff]  ;;  %v176_v5 = vld [vmem:[#allocation5 + $0x348] sm:$0xff]  ;;  %v169_v7 = vld [vmem:[#allocation5 + $0x310] sm:$0xff] }
  0x3c   :  { %383 = vmatpush.msrb.mxu0 %v139_v20  ;;  %412 = vmatpush.msrb.mxu1 %v235_v21  ;;  %v74_v8 = vld [vmem:[#allocation5 + $0x18] sm:$0xff]  ;;  %v165_v10 = vld [vmem:[#allocation5 + $0x2f0] sm:$0xff]  ;;  %v159_v14 = vld [vmem:[#allocation5 + $0x2c0] sm:$0xff] }
  0x3d   :  { %441 = vmatpush.msrb.mxu2 %v140_v22  ;;  %470 = vmatpush.msrb.mxu3 %v236_v23  ;;  %v170_v9 = vld [vmem:[#allocation5 + $0x318] sm:$0xff]  ;;  %v261_v11 = vld [vmem:[#allocation5 + $0x5f0] sm:$0xff]  ;;  %v255_v15 = vld [vmem:[#allocation5 + $0x5c0] sm:$0xff] }
  0x3e   :  { %384 = vmatpush.msrb.mxu0 %v133_v24  ;;  %413 = vmatpush.msrb.mxu1 %v229_v25  ;;  %v166_v12 = vld [vmem:[#allocation5 + $0x2f8] sm:$0xff]  ;;  %v160_v16 = vld [vmem:[#allocation5 + $0x2c8] sm:$0xff]  ;;  %v153_v20 = vld [vmem:[#allocation5 + $0x290] sm:$0xff] }
  0x3f   :  { %442 = vmatpush.msrb.mxu2 %v134_v26  ;;  %471 = vmatpush.msrb.mxu3 %v230_v27  ;;  %v262_v13 = vld [vmem:[#allocation5 + $0x5f8] sm:$0xff]  ;;  %v256_v17 = vld [vmem:[#allocation5 + $0x5c8] sm:$0xff]  ;;  %v249_v21 = vld [vmem:[#allocation5 + $0x590] sm:$0xff] }
  0x40   :  { %385 = vmatpush.msrb.mxu0 %v127_v28  ;;  %414 = vmatpush.msrb.mxu1 %v223_v29  ;;  %v154_v22 = vld [vmem:[#allocation5 + $0x298] sm:$0xff]  ;;  %v147_v24 = vld [vmem:[#allocation5 + $0x260] sm:$0xff]  ;;  %v148_v26 = vld [vmem:[#allocation5 + $0x268] sm:$0xff] }
  0x41   :  { %443 = vmatpush.msrb.mxu2 %v128_v30  ;;  %472 = vmatpush.msrb.mxu3 %v224_v31  ;;  %v250_v23 = vld [vmem:[#allocation5 + $0x598] sm:$0xff]  ;;  %v243_v25 = vld [vmem:[#allocation5 + $0x560] sm:$0xff]  ;;  %v244_v27 = vld [vmem:[#allocation5 + $0x568] sm:$0xff] }
  0x42   :  { %386 = vmatpush.msrb.mxu0 %v121_v32  ;;  %415 = vmatpush.msrb.mxu1 %v217_v33  ;;  %v141_v28 = vld [vmem:[#allocation5 + $0x230] sm:$0xff]  ;;  %v142_v30 = vld [vmem:[#allocation5 + $0x238] sm:$0xff]  ;;  %v135_v32 = vld [vmem:[#allocation5 + $0x200] sm:$0xff] }
  0x43   :  { %444 = vmatpush.msrb.mxu2 %v122_v34  ;;  %473 = vmatpush.msrb.mxu3 %v218_v35  ;;  %v237_v29 = vld [vmem:[#allocation5 + $0x530] sm:$0xff]  ;;  %v238_v31 = vld [vmem:[#allocation5 + $0x538] sm:$0xff]  ;;  %v231_v33 = vld [vmem:[#allocation5 + $0x500] sm:$0xff] }
  0x44   :  { %285 = vmatmul.f32.gmra.mxu0 %v1303_v36  ;;  %314 = vmatmul.f32.gmra.mxu1 %v1305_v37  ;;  %v136_v34 = vld [vmem:[#allocation5 + $0x208] sm:$0xff]  ;;  %v129_v35 = vld [vmem:[#allocation5 + $0x1d0] sm:$0xff] }
  0x45   :  { %343 = vmatmul.f32.gmra.mxu2 %v1303_v36  ;;  %372 = vmatmul.f32.gmra.mxu3 %v1305_v37 }
  0x46   :  { %387 = vmatpush.msrb.mxu0 %v115_v38  ;;  %416 = vmatpush.msrb.mxu1 %v211_v39  ;;  %v225_v38 = vld [vmem:[#allocation5 + $0x4d0] sm:$0xff]  ;;  %v130_v39 = vld [vmem:[#allocation5 + $0x1d8] sm:$0xff] }
  0x47   :  { %445 = vmatpush.msrb.mxu2 %v116_v40  ;;  %474 = vmatpush.msrb.mxu3 %v212_v41  ;;  %v123_v40 = vld [vmem:[#allocation5 + $0x1a0] sm:$0xff] }
  0x48   :  { %388 = vmatpush.msrb.mxu0 %v109_v42  ;;  %417 = vmatpush.msrb.mxu1 %v205_v43  ;;  %v219_v41 = vld [vmem:[#allocation5 + $0x4a0] sm:$0xff]  ;;  %v124_v42 = vld [vmem:[#allocation5 + $0x1a8] sm:$0xff]  ;;  %v117_v43 = vld [vmem:[#allocation5 + $0x170] sm:$0xff] }
  0x49   :  { %446 = vmatpush.msrb.mxu2 %v110_v44  ;;  %475 = vmatpush.msrb.mxu3 %v206_v45  ;;  %v213_v44 = vld [vmem:[#allocation5 + $0x470] sm:$0xff]  ;;  %v111_v45 = vld [vmem:[#allocation5 + $0x140] sm:$0xff] }
  0x4a   :  { %389 = vmatpush.msrb.mxu0 %v103_v46  ;;  %418 = vmatpush.msrb.mxu1 %v199_v47  ;;  %v105_v46 = vld [vmem:[#allocation5 + $0x110] sm:$0xff]  ;;  %v99_v47 = vld [vmem:[#allocation5 + $0xe0] sm:$0xff] }
  0x4b   :  { %447 = vmatpush.msrb.mxu2 %v104_v48  ;;  %476 = vmatpush.msrb.mxu3 %v200_v49  ;;  %v93_v48 = vld [vmem:[#allocation5 + $0xb0] sm:$0xff]  ;;  %v207_v49 = vld [vmem:[#allocation5 + $0x440] sm:$0xff] }
  0x4c   :  { %390 = vmatpush.msrb.mxu0 %v97_v50  ;;  %419 = vmatpush.msrb.mxu1 %v193_v51  ;;  %v118_v50 = vld [vmem:[#allocation5 + $0x178] sm:$0xff]  ;;  %v232_v51 = vld [vmem:[#allocation5 + $0x508] sm:$0xff] }
  0x4d   :  { %448 = vmatpush.msrb.mxu2 %v98_v52  ;;  %477 = vmatpush.msrb.mxu3 %v194_v53  ;;  %v87_v52 = vld [vmem:[#allocation5 + $0x80] sm:$0xff]  ;;  %v201_v53 = vld [vmem:[#allocation5 + $0x410] sm:$0xff] }
  0x4e   :  { %288 = vmatmul.f32.gmra.mxu0 %v1311_v54  ;;  %317 = vmatmul.f32.gmra.mxu1 %v1313_v55 }
  0x4f   :  { %346 = vmatmul.f32.gmra.mxu2 %v1311_v54  ;;  %375 = vmatmul.f32.gmra.mxu3 %v1313_v55 }
  0x50   :  { %391 = vmatpush.msrb.mxu0 %v91_v56  ;;  %420 = vmatpush.msrb.mxu1 %v187_v57  ;;  %v112_v56 = vld [vmem:[#allocation5 + $0x148] sm:$0xff]  ;;  %v226_v57 = vld [vmem:[#allocation5 + $0x4d8] sm:$0xff] }
  0x51   :  { %449 = vmatpush.msrb.mxu2 %v92_v58  ;;  %478 = vmatpush.msrb.mxu3 %v188_v59  ;;  %v81_v58 = vld [vmem:[#allocation5 + $0x50] sm:$0xff]  ;;  %v195_v59 = vld [vmem:[#allocation5 + $0x3e0] sm:$0xff] }
  0x52   :  { %392 = vmatpush.msrb.mxu0 %v85_v60  ;;  %421 = vmatpush.msrb.mxu1 %v181_v61  ;;  %v106_v60 = vld [vmem:[#allocation5 + $0x118] sm:$0xff]  ;;  %v220_v61 = vld [vmem:[#allocation5 + $0x4a8] sm:$0xff] }
  0x53   :  { %450 = vmatpush.msrb.mxu2 %v86_v62  ;;  %479 = vmatpush.msrb.mxu3 %v182_v63  ;;  %v75_v62 = vld [vmem:[#allocation5 + $0x20] sm:$0xff]  ;;  %v189_v63 = vld [vmem:[#allocation5 + $0x3b0] sm:$0xff] }
  0x54   :  { %393 = vmatpush.msrb.mxu0 %v79_v2  ;;  %422 = vmatpush.msrb.mxu1 %v175_v3  ;;  %v100_v2 = vld [vmem:[#allocation5 + $0xe8] sm:$0xff]  ;;  %v214_v3 = vld [vmem:[#allocation5 + $0x478] sm:$0xff] }
  0x55   :  { %451 = vmatpush.msrb.mxu2 %v80_v4  ;;  %480 = vmatpush.msrb.mxu3 %v176_v5  ;;  %v183_v4 = vld [vmem:[#allocation5 + $0x380] sm:$0xff]  ;;  %v94_v5 = vld [vmem:[#allocation5 + $0xb8] sm:$0xff] }
  0x56   :  { %394 = vmatpush.msrb.mxu0 %v73_v6  ;;  %423 = vmatpush.msrb.mxu1 %v169_v7  ;;  %v208_v6 = vld [vmem:[#allocation5 + $0x448] sm:$0xff]  ;;  %v177_v7 = vld [vmem:[#allocation5 + $0x350] sm:$0xff] }
  0x57   :  { %452 = vmatpush.msrb.mxu2 %v74_v8  ;;  %481 = vmatpush.msrb.mxu3 %v170_v9  ;;  %v88_v8 = vld [vmem:[#allocation5 + $0x88] sm:$0xff]  ;;  %v202_v9 = vld [vmem:[#allocation5 + $0x418] sm:$0xff] }
  0x58   :  { %395 = vmatmul.f32.vlgmr.msrb.gmra.mxu0 %v1287_v0  ;;  %424 = vmatmul.f32.vlgmr.msrb.gmra.mxu1 %v1289_v1 }
  0x59   :  { %453 = vmatmul.f32.vlgmr.msrb.gmra.mxu2 %v1287_v0  ;;  %482 = vmatmul.f32.vlgmr.msrb.gmra.mxu3 %v1289_v1 }
  0x5a   :  { %495 = vmatpush.msra.mxu0 %v165_v10  ;;  %524 = vmatpush.msra.mxu1 %v261_v11  ;;  %v171_v10 = vld [vmem:[#allocation5 + $0x320] sm:$0xff]  ;;  %v82_v11 = vld [vmem:[#allocation5 + $0x58] sm:$0xff] }
  0x5b   :  { %553 = vmatpush.msra.mxu2 %v166_v12  ;;  %582 = vmatpush.msra.mxu3 %v262_v13  ;;  %v196_v12 = vld [vmem:[#allocation5 + $0x3e8] sm:$0xff] }
  0x5c   :  { %496 = vmatpush.msra.mxu0 %v159_v14  ;;  %525 = vmatpush.msra.mxu1 %v255_v15  ;;  %v76_v13 = vld [vmem:[#allocation5 + $0x28] sm:$0xff]  ;;  %v190_v14 = vld [vmem:[#allocation5 + $0x3b8] sm:$0xff] }
  0x5d   :  { %554 = vmatpush.msra.mxu2 %v160_v16  ;;  %583 = vmatpush.msra.mxu3 %v256_v17  ;;  %v184_v15 = vld [vmem:[#allocation5 + $0x388] sm:$0xff]  ;;  %v178_v16 = vld [vmem:[#allocation5 + $0x358] sm:$0xff] }
  0x5e   :  { %497 = vmatpush.msra.mxu0 %v153_v20  ;;  %526 = vmatpush.msra.mxu1 %v249_v21  ;;  %v172_v17 = vld [vmem:[#allocation5 + $0x328] sm:$0xff] }
  0x5f   :  { %555 = vmatpush.msra.mxu2 %v154_v22  ;;  %584 = vmatpush.msra.mxu3 %v250_v23 }
  0x60   :  { %398 = vmatmul.f32.gmra.mxu0 %v1295_v18  ;;  %427 = vmatmul.f32.gmra.mxu1 %v1297_v19 }
  0x61   :  { %456 = vmatmul.f32.gmra.mxu2 %v1295_v18  ;;  %485 = vmatmul.f32.gmra.mxu3 %v1297_v19 }
  0x62   :  { %498 = vmatpush.msra.mxu0 %v147_v24  ;;  %527 = vmatpush.msra.mxu1 %v243_v25 }
  0x63   :  { %556 = vmatpush.msra.mxu2 %v148_v26  ;;  %585 = vmatpush.msra.mxu3 %v244_v27 }
  0x64   :  { %499 = vmatpush.msra.mxu0 %v141_v28  ;;  %528 = vmatpush.msra.mxu1 %v237_v29 }
  0x65   :  { %557 = vmatpush.msra.mxu2 %v142_v30  ;;  %586 = vmatpush.msra.mxu3 %v238_v31  ;;  %v611_v31 = vld [vmem:[#allocation7] sm:$0xf] }
  0x66   :  { %500 = vmatpush.msra.mxu0 %v135_v32  ;;  %529 = vmatpush.msra.mxu1 %v231_v33  ;;  %v615_v32 = vperm.slane %v611_v31, 2 }
  0x67   :  { %558 = vmatpush.msra.mxu2 %v136_v34  ;;  %587 = vmatpush.msra.mxu3 %v232_v51 }
  0x68   :  { %401 = vmatmul.f32.gmra.mxu0 %v1303_v36  ;;  %430 = vmatmul.f32.gmra.mxu1 %v1305_v37 }
  0x69   :  { %459 = vmatmul.f32.gmra.mxu2 %v1303_v36  ;;  %488 = vmatmul.f32.gmra.mxu3 %v1305_v37 }
  0x6a   :  { %501 = vmatpush.msra.mxu0 %v129_v35  ;;  %530 = vmatpush.msra.mxu1 %v225_v38  ;;  %v613_v35 = vperm.slane %v611_v31, 0 }
  0x6b   :  { %559 = vmatpush.msra.mxu2 %v130_v39  ;;  %588 = vmatpush.msra.mxu3 %v226_v57 }
  0x6c   :  { %502 = vmatpush.msra.mxu0 %v123_v40  ;;  %531 = vmatpush.msra.mxu1 %v219_v41  ;;  %v616_v40 = vperm.slane %v611_v31, 3 }
  0x6d   :  { %560 = vmatpush.msra.mxu2 %v124_v42  ;;  %589 = vmatpush.msra.mxu3 %v220_v61 }
  0x6e   :  { %503 = vmatpush.msra.mxu0 %v117_v43  ;;  %532 = vmatpush.msra.mxu1 %v213_v44 }
  0x6f   :  { %561 = vmatpush.msra.mxu2 %v118_v50  ;;  %590 = vmatpush.msra.mxu3 %v214_v3 }
  0x70   :  { %404 = vmatmul.f32.gmra.mxu0 %v1311_v54  ;;  %433 = vmatmul.f32.gmra.mxu1 %v1313_v55 }
  0x71   :  { %462 = vmatmul.f32.gmra.mxu2 %v1311_v54  ;;  %491 = vmatmul.f32.gmra.mxu3 %v1313_v55 }
  0x72   :  { %504 = vmatpush.msra.mxu0 %v111_v45  ;;  %533 = vmatpush.msra.mxu1 %v207_v49 }
  0x73   :  { %562 = vmatpush.msra.mxu2 %v112_v56  ;;  %591 = vmatpush.msra.mxu3 %v208_v6 }
  0x74   :  { %505 = vmatpush.msra.mxu0 %v105_v46  ;;  %534 = vmatpush.msra.mxu1 %v201_v53  ;;  %v614_v46 = vperm.slane %v611_v31, 1 }
  0x75   :  { %563 = vmatpush.msra.mxu2 %v106_v60  ;;  %592 = vmatpush.msra.mxu3 %v202_v9 }
  0x76   :  { %506 = vmatpush.msra.mxu0 %v99_v47  ;;  %535 = vmatpush.msra.mxu1 %v195_v59 }
  0x77   :  { %564 = vmatpush.msra.mxu2 %v100_v2  ;;  %593 = vmatpush.msra.mxu3 %v196_v12 }
  0x78   :  { %507 = vmatpush.msra.mxu0 %v93_v48  ;;  %536 = vmatpush.msra.mxu1 %v189_v63 }
  0x79   :  { %565 = vmatpush.msra.mxu2 %v94_v5  ;;  %594 = vmatpush.msra.mxu3 %v190_v14 }
  0x7a   :  { %508 = vmatpush.msra.mxu0 %v87_v52  ;;  %537 = vmatpush.msra.mxu1 %v183_v4 }
  0x7b   :  { %566 = vmatpush.msra.mxu2 %v88_v8  ;;  %595 = vmatpush.msra.mxu3 %v184_v15 }
  0x7c   :  { %509 = vmatpush.msra.mxu0 %v81_v58  ;;  %538 = vmatpush.msra.mxu1 %v177_v7 }
  0x7d   :  { %567 = vmatpush.msra.mxu2 %v82_v11  ;;  %596 = vmatpush.msra.mxu3 %v178_v16 }
  0x7e   :  { %510 = vmatpush.msra.mxu0 %v75_v62  ;;  %539 = vmatpush.msra.mxu1 %v171_v10 }
  0x7f   :  { %511 = vmatmul.f32.vlgmr.msra.gmra.mxu0 %v1287_v0  ;;  %540 = vmatmul.f32.vlgmr.msra.gmra.mxu1 %v1289_v1 }
  0x80   :  { %568 = vmatpush.msra.mxu2 %v76_v13  ;;  %597 = vmatpush.msra.mxu3 %v172_v17 }
  0x81   :  { %569 = vmatmul.f32.vlgmr.msra.gmra.mxu2 %v1287_v0  ;;  %598 = vmatmul.f32.vlgmr.msra.gmra.mxu3 %v1289_v1 }
  0x87   :  { %514 = vmatmul.f32.gmra.mxu0 %v1295_v18  ;;  %543 = vmatmul.f32.gmra.mxu1 %v1297_v19 }
  0x89   :  { %572 = vmatmul.f32.gmra.mxu2 %v1295_v18  ;;  %601 = vmatmul.f32.gmra.mxu3 %v1297_v19 }
  0x8f   :  { %517 = vmatmul.f32.gmra.mxu0 %v1303_v36  ;;  %546 = vmatmul.f32.gmra.mxu1 %v1305_v37 }
  0x91   :  { %575 = vmatmul.f32.gmra.mxu2 %v1303_v36  ;;  %604 = vmatmul.f32.gmra.mxu3 %v1305_v37 }
  0x97   :  { %520 = vmatmul.f32.gmra.mxu0 %v1311_v54  ;;  %549 = vmatmul.f32.gmra.mxu1 %v1313_v55 }
  0x99   :  { %578 = vmatmul.f32.gmra.mxu2 %v1311_v54  ;;  %607 = vmatmul.f32.gmra.mxu3 %v1313_v55 }
  0xad   :  { %v280_v20 = vpop.f32.mrf.mxu0  ;;  %v309_v21 = vpop.f32.mrf.mxu1 }
  0xae   :  { %v310_v54 = vadd.f32 %v309_v21, %v280_v20 }
  0xb0   :  { %v621_v39 = vadd.f32 %v613_v35, %v310_v54 }
  0xb4   :  { %v338_v0 = vpop.f32.mrf.mxu2  ;;  %v367_v22 = vpop.f32.mrf.mxu3 }
  0xb5   :  { %v368_v45 = vadd.f32 %v367_v22, %v338_v0 }
  0xb7   :  { %v283_v23 = vpop.f32.mrf.mxu0  ;;  %v312_v24 = vpop.f32.mrf.mxu1  ;;  %v622_v51 = vadd.f32 %v614_v46, %v368_v45 }
  0xb8   :  { %v313_v48 = vadd.f32 %v312_v24, %v283_v23 }
  0xba   :  { %v625_v52 = vadd.f32 %v613_v35, %v313_v48 }
  0xbe   :  { %v341_v1 = vpop.f32.mrf.mxu2  ;;  %v370_v18 = vpop.f32.mrf.mxu3 }
  0xbf   :  { %v371_v60 = vadd.f32 %v370_v18, %v341_v1 }
  0xc1   :  { %v286_v25 = vpop.f32.mrf.mxu0  ;;  %v315_v26 = vpop.f32.mrf.mxu1  ;;  %v626_v3 = vadd.f32 %v614_v46, %v371_v60 }
  0xc2   :  { %v316_v62 = vadd.f32 %v315_v26, %v286_v25 }
  0xc4   :  { %v629_v4 = vadd.f32 %v613_v35, %v316_v62 }
  0xc8   :  { %v344_v19 = vpop.f32.mrf.mxu2  ;;  %v373_v27 = vpop.f32.mrf.mxu3 }
  0xc9   :  { %v374_v10 = vadd.f32 %v373_v27, %v344_v19 }
  0xcb   :  { %v289_v28 = vpop.f32.mrf.mxu0  ;;  %v318_v36 = vpop.f32.mrf.mxu1  ;;  %v630_v15 = vadd.f32 %v614_v46, %v374_v10 }
  0xcc   :  { %v319_v12 = vadd.f32 %v318_v36, %v289_v28 }
  0xce   :  { %v633_v16 = vadd.f32 %v613_v35, %v319_v12 }
  0xd2   :  { %v1351_v29 = vpop.f32.mrf.mxu2  ;;  %v1353_v30 = vpop.f32.mrf.mxu3 }
  0xd3   :  { %v377_v0 = vadd.f32 %v1353_v30, %v1351_v29 }
  0xd5   :  { %v396_v33 = vpop.f32.mrf.mxu0  ;;  %v425_v37 = vpop.f32.mrf.mxu1  ;;  %v634_v23 = vadd.f32 %v614_v46, %v377_v0 }
  0xd6   :  { %v426_v34 = vadd.f32 %v425_v37, %v396_v33 }
  0xd8   :  { %v623_v38 = vadd.f32 %v615_v32, %v426_v34 }
  0xda   :  { %652 = vmatpush.xpose.msrb.mxu0 %v623_v38 }
  0xdc   :  { %v454_v55 = vpop.f32.mrf.mxu2  ;;  %v483_v41 = vpop.f32.mrf.mxu3 }
  0xdd   :  { %v484_v42 = vadd.f32 %v483_v41, %v454_v55  ;;  %v399_v43 = vpop.f32.mrf.mxu0  ;;  %v428_v44 = vpop.f32.mrf.mxu1  ;;  %653 = vmatmul.f32.vlgmr.msrb.gmra.mxu0 %v621_v39 }
  0xde   :  { %v429_v47 = vadd.f32 %v428_v44, %v399_v43 }
  0xdf   :  { %v624_v49 = vadd.f32 %v616_v40, %v484_v42 }
  0xe0   :  { %v627_v50 = vadd.f32 %v615_v32, %v429_v47 }
  0xe1   :  { %672 = vmatpush.xpose.msrb.mxu1 %v624_v49 }
  0xe2   :  { %692 = vmatpush.xpose.msrb.mxu2 %v627_v50 }
  0xe4   :  { %v457_v53 = vpop.f32.mrf.mxu2  ;;  %v486_v56 = vpop.f32.mrf.mxu3  ;;  %673 = vmatmul.f32.vlgmr.msrb.gmra.mxu1 %v622_v51 }
  0xe5   :  { %v487_v57 = vadd.f32 %v486_v56, %v457_v53  ;;  %v402_v58 = vpop.f32.mrf.mxu0  ;;  %v431_v59 = vpop.f32.mrf.mxu1  ;;  %693 = vmatmul.f32.vlgmr.msrb.gmra.mxu2 %v625_v52 }
  0xe6   :  { %v432_v61 = vadd.f32 %v431_v59, %v402_v58 }
  0xe7   :  { %v628_v63 = vadd.f32 %v616_v40, %v487_v57 }
  0xe8   :  { %v631_v2 = vadd.f32 %v615_v32, %v432_v61 }
  0xe9   :  { %712 = vmatpush.xpose.msrb.mxu3 %v628_v63 }
  0xea   :  { %732 = vmatpush.xpose.msra.mxu0 %v631_v2 }
  0xec   :  { %v460_v5 = vpop.f32.mrf.mxu2  ;;  %v489_v6 = vpop.f32.mrf.mxu3  ;;  %713 = vmatmul.f32.vlgmr.msrb.gmra.mxu3 %v626_v3 }
  0xed   :  { %v490_v7 = vadd.f32 %v489_v6, %v460_v5  ;;  %v405_v8 = vpop.f32.mrf.mxu0  ;;  %v434_v9 = vpop.f32.mrf.mxu1  ;;  %733 = vmatmul.f32.vlgmr.msra.gmra.mxu0 %v629_v4 }
  0xee   :  { %v435_v11 = vadd.f32 %v434_v9, %v405_v8 }
  0xef   :  { %v632_v13 = vadd.f32 %v616_v40, %v490_v7 }
  0xf0   :  { %v635_v14 = vadd.f32 %v615_v32, %v435_v11 }
  0xf1   :  { %752 = vmatpush.xpose.msra.mxu1 %v632_v13 }
  0xf2   :  { %772 = vmatpush.xpose.msra.mxu2 %v635_v14 }
  0xf4   :  { %v463_v17 = vpop.f32.mrf.mxu2  ;;  %v492_v20 = vpop.f32.mrf.mxu3  ;;  %753 = vmatmul.f32.vlgmr.msra.gmra.mxu1 %v630_v15 }
  0xf5   :  { %v493_v21 = vadd.f32 %v492_v20, %v463_v17  ;;  %773 = vmatmul.f32.vlgmr.msra.gmra.mxu2 %v633_v16 }
  0xf7   :  { %v636_v22 = vadd.f32 %v616_v40, %v493_v21 }
  0xf9   :  { %792 = vmatpush.xpose.msra.mxu3 %v636_v22 }
  0xfc   :  { %793 = vmatmul.f32.vlgmr.msra.gmra.mxu3 %v634_v23  ;;  %v512_v24 = vpop.f32.mrf.mxu0  ;;  %v541_v1 = vpop.f32.mrf.mxu1 }
  0xfd   :  { %v542_v18 = vadd.f32 %v541_v1, %v512_v24 }
  0xff   :  { %918 = vmatpush.msrb.mxu0 %v542_v18 }
 0x104   :  { %v515_v25 = vpop.f32.mrf.mxu0  ;;  %v544_v26 = vpop.f32.mrf.mxu1 }
 0x105   :  { %v545_v19 = vadd.f32 %v544_v26, %v515_v25  ;;  %v570_v27 = vpop.f32.mrf.mxu2  ;;  %v599_v36 = vpop.f32.mrf.mxu3 }
 0x106   :  { %v600_v32 = vadd.f32 %v599_v36, %v570_v27 }
 0x107   :  { %961 = vmatpush.msrb.mxu2 %v545_v19 }
 0x108   :  { %938 = vmatpush.msrb.mxu1 %v600_v32 }
 0x10c   :  { %v518_v28 = vpop.f32.mrf.mxu0  ;;  %v547_v31 = vpop.f32.mrf.mxu1 }
 0x10d   :  { %v548_v33 = vadd.f32 %v547_v31, %v518_v28  ;;  %v573_v29 = vpop.f32.mrf.mxu2  ;;  %v602_v37 = vpop.f32.mrf.mxu3 }
 0x10e   :  { %v603_v54 = vadd.f32 %v602_v37, %v573_v29 }
 0x10f   :  { %1004 = vmatpush.msra.mxu0 %v548_v33 }
 0x110   :  { %981 = vmatpush.msrb.mxu3 %v603_v54 }
 0x114   :  { %v521_v30 = vpop.f32.mrf.mxu0  ;;  %v550_v34 = vpop.f32.mrf.mxu1 }
 0x115   :  { %v551_v35 = vadd.f32 %v550_v34, %v521_v30  ;;  %v576_v38 = vpop.f32.mrf.mxu2  ;;  %v605_v39 = vpop.f32.mrf.mxu3 }
 0x116   :  { %v606_v40 = vadd.f32 %v605_v39, %v576_v38 }
 0x117   :  { %1047 = vmatpush.msra.mxu2 %v551_v35 }
 0x118   :  { %1024 = vmatpush.msra.mxu1 %v606_v40 }
 0x11d   :  { %v579_v55 = vpop.f32.mrf.mxu2  ;;  %v608_v41 = vpop.f32.mrf.mxu3 }
 0x11e   :  { %v609_v42 = vadd.f32 %v608_v41, %v579_v55 }
 0x120   :  { %1067 = vmatpush.msra.mxu3 %v609_v42 }
 0x15a   :  { %v654_v48 = vpop.f32.mrf.mxu0 }
 0x161   :  { %v674_v47 = vpop.f32.mrf.mxu1 }
 0x162   :  { %v675_v49 = vadd.f32 %v674_v47, %v654_v48 }
 0x164   :  { %v798_v50 = vsel %vm797_vm0, %v675_v49, -inf }
 0x168   :  { %v694_v43 = vpop.f32.mrf.mxu2 }
 0x16a   :  { %v734_v58 = vpop.f32.mrf.mxu0 }
 0x16f   :  { %v714_v44 = vpop.f32.mrf.mxu3 }
 0x170   :  { %v715_v45 = vadd.f32 %v714_v44, %v694_v43 }
 0x171   :  { %v754_v57 = vpop.f32.mrf.mxu1 }
 0x172   :  { %v801_v46 = vsel %vm797_vm0, %v715_v45, -inf  ;;  %v755_v59 = vadd.f32 %v754_v57, %v734_v58 }
 0x173   :  { %802 = vmax.xlane.f32.xlu0 %v801_v46 }
 0x174   :  { %v804_v60 = vsel %vm797_vm0, %v755_v59, -inf }
 0x178   :  { %v774_v51 = vpop.f32.mrf.mxu2 }
 0x17b   :  { %799 = vmax.xlane.f32.xlu0 %v798_v50 }
 0x17f   :  { %v794_v52 = vpop.f32.mrf.mxu3 }
 0x180   :  { %v795_v53 = vadd.f32 %v794_v52, %v774_v51 }
 0x182   :  { %v807_v56 = vsel %vm797_vm0, %v795_v53, -inf }
 0x183   :  { %808 = vmax.xlane.f32.xlu1 %v807_v56 }
 0x18b   :  { %805 = vmax.xlane.f32.xlu1 %v804_v60 }
 0x1e6   :  { %v803_v61 = vpop.xlane.xlu0 %802 }
 0x1e7   :  { %v811_v62 = vsub.f32 %v715_v45, %v803_v61 }
 0x1e9   :  { %v816_v63 = vmul.f32 1.442695, %v811_v62 }
 0x1eb   :  { %1124 = vpow2.f32 %v816_v63 }
 0x1ee   :  { %v800_v2 = vpop.xlane.xlu0 %799 }
 0x1ef   :  { %v810_v3 = vsub.f32 %v675_v49, %v800_v2 }
 0x1f1   :  { %v1125_v4 = vpop.eup %1124  ;;  %v814_v5 = vmul.f32 1.442695, %v810_v3  ;;  %v894_v3 = vld [vmem:[%s1393_s3] sm:$0x3]  ;;  %s1249_s3 = smov [#allocation8]  }
 0x1f2   :  { %v825_v6 = vsel %vm797_vm0, %v1125_v4, 0.0  ;;  %s1092_s7 = sshll.u32 %s1249_s3, 4  ;;  %s1093_s7 = int_to_ptr.vmem [resolvable:$true] %s1092_s7 }
 0x1f3   :  { %1126 = vpow2.f32 %v814_v5  ;;  %826 = vadd.xlane.f32.xlu2 %v825_v6  ;;  %v897_v5 = vperm.slane %v894_v3, 1 }
 0x1f6   :  { %v809_v7 = vpop.xlane.xlu1 %808 }
 0x1f7   :  { %v813_v8 = vsub.f32 %v795_v53, %v809_v7 }
 0x1f9   :  { %v1127_v9 = vpop.eup %1126  ;;  %v820_v10 = vmul.f32 1.442695, %v813_v8 }
 0x1fa   :  { %v822_v11 = vsel %vm797_vm0, %v1127_v9, 0.0 }
 0x1fb   :  { %1128 = vpow2.f32 %v820_v10  ;;  %823 = vadd.xlane.f32.xlu2 %v822_v11 }
 0x1fe   :  { %v806_v12 = vpop.xlane.xlu1 %805 }
 0x1ff   :  { %v812_v13 = vsub.f32 %v755_v59, %v806_v12 }
 0x201   :  { %v1363_v14 = vpop.eup %1128  ;;  %v818_v15 = vmul.f32 1.442695, %v812_v13 }
 0x202   :  { %v831_v16 = vsel %vm797_vm0, %v1363_v14, 0.0 }
 0x203   :  { %1130 = vpow2.f32 %v818_v15  ;;  %832 = vadd.xlane.f32.xlu0 %v831_v16 }
 0x209   :  { %v1367_v17 = vpop.eup %1130 }
 0x20a   :  { %v828_v20 = vsel %vm797_vm0, %v1367_v17, 0.0 }
 0x20b   :  { %829 = vadd.xlane.f32.xlu1 %v828_v20 }
 0x266   :  { %v827_v21 = vpop.xlane.xlu2 %826 }
 0x267   :  { %1132 = vrcp.f32 %v827_v21  ;;  %v860_v1 = vand.u32 2147483648, %v827_v21  ;;  %v858_v25 = vand.u32 2147483647, %v827_v21  ;;  %vm854_vm2 = vweird.f32 %v827_v21 }
 0x269   :  { %v861_v27 = vor.u32 1.1754944e-38, %v860_v1  ;;  %vm859_vm4 = vcmp.eq.f32.partialorder %v858_v25, 8.507059e+37 }
 0x26d   :  { %v1133_v0 = vpop.eup %1132 }
 0x26e   :  { %v850_v22 = vmul.f32 %v1133_v0, %v827_v21  ;;  %v824_v23 = vpop.xlane.xlu2 %823  ;;  %vm855_vm1 = vweird.f32 %v1133_v0 }
 0x26f   :  { %1134 = vrcp.f32 %v824_v23  ;;  %vm856_vm3 = vmor %vm854_vm2, %vm855_vm1  ;;  %v845_v30 = vand.u32 2147483648, %v824_v23  ;;  %v843_v34 = vand.u32 2147483647, %v824_v23  ;;  %vm839_vm6 = vweird.f32 %v824_v23 }
 0x270   :  { %v851_v24 = vsub.f32 1.0, %v850_v22 }
 0x271   :  { %v846_v38 = vor.u32 1.1754944e-38, %v845_v30  ;;  %vm844_vm8 = vcmp.eq.f32.partialorder %v843_v34, 8.507059e+37 }
 0x272   :  { %v852_v18 = vmul.f32 %v1133_v0, %v851_v24 }
 0x274   :  { %v853_v26 = vadd.f32 %v1133_v0, %v852_v18 }
 0x275   :  { %v1135_v19 = vpop.eup %1134 }
 0x276   :  { %v857_v28 = vsel %vm856_vm3, %v1133_v0, %v853_v26  ;;  %v835_v36 = vmul.f32 %v1135_v19, %v824_v23  ;;  %v833_v31 = vpop.xlane.xlu0 %832  ;;  %vm840_vm5 = vweird.f32 %v1135_v19 }
 0x277   :  { %v862_v32 = vsel %vm859_vm4, %v861_v27, %v857_v28  ;;  %1136 = vrcp.f32 %v833_v31  ;;  %vm841_vm7 = vmor %vm839_vm6, %vm840_vm5  ;;  %v890_v44 = vand.u32 2147483648, %v833_v31  ;;  %v888_v46 = vand.u32 2147483647, %v833_v31 }
 0x278   :  { %v836_v33 = vsub.f32 1.0, %v835_v36  ;;  %v863_v29 = vmul.f32 %v1125_v4, %v862_v32  ;;  %vm884_vm10 = vweird.f32 %v833_v31  ;;  %v896_v4 = vperm.slane %v894_v3, 0 }
 0x279   :  { %v891_v49 = vor.u32 1.1754944e-38, %v890_v44  ;;  %vm889_vm12 = vcmp.eq.f32.partialorder %v888_v46, 8.507059e+37 }
 0x27a   :  { %v837_v37 = vmul.f32 %v1135_v19, %v836_v33  ;;  %1110 = vmatmul.msk.f32.vlgmr.msrb.gmra.mxu2 %vm797_vm0, %v863_v29  ;;  %1111 = vmatmul.msk.f32.vlgmr.msrb.gmra.mxu3 %vm797_vm0, %v863_v29 }
 0x27c   :  { %v838_v54 = vadd.f32 %v1135_v19, %v837_v37 }
 0x27d   :  { %v1137_v35 = vpop.eup %1136 }
 0x27e   :  { %v842_v39 = vsel %vm841_vm7, %v1135_v19, %v838_v54  ;;  %v880_v40 = vmul.f32 %v1137_v35, %v833_v31  ;;  %v830_v55 = vpop.xlane.xlu1 %829  ;;  %vm885_vm9 = vweird.f32 %v1137_v35 }
 0x27f   :  { %v847_v41 = vsel %vm844_vm8, %v846_v38, %v842_v39  ;;  %1138 = vrcp.f32 %v830_v55  ;;  %vm886_vm11 = vmor %vm884_vm10, %vm885_vm9  ;;  %v875_v57 = vand.u32 2147483648, %v830_v55  ;;  %v873_v59 = vand.u32 2147483647, %v830_v55 }
 0x280   :  { %v848_v42 = vmul.f32 %v1127_v9, %v847_v41  ;;  %v881_v43 = vsub.f32 1.0, %v880_v40  ;;  %vm869_vm14 = vweird.f32 %v830_v55 }
 0x281   :  { %v876_v61 = vor.u32 1.1754944e-38, %v875_v57  ;;  %vm874_vm1 = vcmp.eq.f32.partialorder %v873_v59, 8.507059e+37 }
 0x282   :  { %v882_v45 = vmul.f32 %v1137_v35, %v881_v43  ;;  %1108 = vmatmul.msk.f32.vlgmr.msrb.gmra.mxu0 %vm797_vm0, %v848_v42  ;;  %1109 = vmatmul.msk.f32.vlgmr.msrb.gmra.mxu1 %vm797_vm0, %v848_v42 }
 0x284   :  { %v883_v47 = vadd.f32 %v1137_v35, %v882_v45 }
 0x285   :  { %v1139_v48 = vpop.eup %1138 }
 0x286   :  { %v887_v50 = vsel %vm886_vm11, %v1137_v35, %v883_v47  ;;  %v865_v51 = vmul.f32 %v1139_v48, %v830_v55  ;;  %vm870_vm13 = vweird.f32 %v1139_v48 }
 0x287   :  { %v892_v52 = vsel %vm889_vm12, %v891_v49, %v887_v50  ;;  %vm871_vm15 = vmor %vm869_vm14, %vm870_vm13 }
 0x288   :  { %v893_v53 = vmul.f32 %v1363_v14, %v892_v52  ;;  %v866_v56 = vsub.f32 1.0, %v865_v51 }
 0x28a   :  { %v867_v58 = vmul.f32 %v1139_v48, %v866_v56  ;;  %1114 = vmatmul.msk.f32.vlgmr.msra.gmra.mxu2 %vm797_vm0, %v893_v53  ;;  %1115 = vmatmul.msk.f32.vlgmr.msra.gmra.mxu3 %vm797_vm0, %v893_v53 }
 0x28c   :  { %v868_v60 = vadd.f32 %v1139_v48, %v867_v58 }
 0x28e   :  { %v872_v62 = vsel %vm871_vm15, %v1139_v48, %v868_v60 }
 0x28f   :  { %v877_v63 = vsel %vm874_vm1, %v876_v61, %v872_v62 }
 0x290   :  { %v878_v2 = vmul.f32 %v1367_v17, %v877_v63 }
 0x292   :  { %1112 = vmatmul.msk.f32.vlgmr.msra.gmra.mxu0 %vm797_vm0, %v878_v2  ;;  %1113 = vmatmul.msk.f32.vlgmr.msra.gmra.mxu1 %vm797_vm0, %v878_v2 }
 0x2fd   :  { %v963_v6 = vpop.f32.mrf.mxu2  ;;  %v983_v7 = vpop.f32.mrf.mxu3 }
 0x2fe   :  { %v964_v8 = vadd.f32 %v963_v6, %v896_v4  ;;  %v984_v9 = vadd.f32 %v983_v7, %v897_v5 }
 0x2ff   :  { %v920_v10 = vpop.f32.mrf.mxu0  ;;  %v940_v11 = vpop.f32.mrf.mxu1 }
 0x300   :  { %v1074_v12 = vmax.f32 %v964_v8, 0.0  ;;  %v1075_v13 = vmax.f32 %v984_v9, 0.0  ;;  %v921_v14 = vadd.f32 %v920_v10, %v896_v4  ;;  %v941_v15 = vadd.f32 %v940_v11, %v897_v5 }
 0x302   :  { %1082 = vst [vmem:[#allocation8 + $0x10] sm:$0xff] %v1074_v12  ;;  %v1072_v16 = vmax.f32 %v921_v14, 0.0  ;;  %v1073_v17 = vmax.f32 %v941_v15, 0.0 }
 0x303   :  { %1083 = vst [vmem:[#allocation8 + $0x18] sm:$0xff] %v1075_v13 }
 0x304   :  { %1080 = vst [vmem:[#allocation8] sm:$0xff] %v1072_v16 }
 0x305   :  { %1081 = vst [vmem:[#allocation8 + $0x8] sm:$0xff] %v1073_v17 }
 0x30d   :  { %v1049_v20 = vpop.f32.mrf.mxu2  ;;  %v1069_v21 = vpop.f32.mrf.mxu3 }
 0x30e   :  { %v1050_v0 = vadd.f32 %v1049_v20, %v896_v4  ;;  %v1070_v22 = vadd.f32 %v1069_v21, %v897_v5 }
 0x30f   :  { %v1006_v23 = vpop.f32.mrf.mxu0  ;;  %v1026_v24 = vpop.f32.mrf.mxu1 }
 0x310   :  { %v1078_v1 = vmax.f32 %v1050_v0, 0.0  ;;  %v1079_v18 = vmax.f32 %v1070_v22, 0.0  ;;  %v1007_v25 = vadd.f32 %v1006_v23, %v896_v4  ;;  %v1027_v26 = vadd.f32 %v1026_v24, %v897_v5 }
 0x312   :  { %1086 = vst [vmem:[#allocation8 + $0x30] sm:$0xff] %v1078_v1  ;;  %v1076_v19 = vmax.f32 %v1007_v25, 0.0  ;;  %v1077_v27 = vmax.f32 %v1027_v26, 0.0 }
 0x313   :  { %1087 = vst [vmem:[#allocation8 + $0x38] sm:$0xff] %v1079_v18 }
 0x314   :  { %1084 = vst [vmem:[#allocation8 + $0x20] sm:$0xff] %v1076_v19 }
 0x315   :  { %1085 = vst [vmem:[#allocation8 + $0x28] sm:$0xff] %v1077_v27 }
 0x316   :  { %1100 = dma.vmem_to_hbm [thread:$0]  %s1093_s7, 1024, %s1095_s10, [#allocation4], %s1246_s27, %s1246_s27, %s1247_s28  }
 0x317   :  { %1240 = dma.done.wait [#allocation4], 1024  }
 0x318   :  { %1241 = vsyncadd [#allocation4], 4294966272 }
 0x319   :  { %1105 = vsyncpa [#allocation3], 1 }
 0x31a   :  { %1106 = vsyncpa [#allocation6], 1 }
 0x31b   :  { %1107 = vsyncpa [#allocation4], 1 }

</bundles_post_ra>
